<compile_context>
chip_gen: v6e
topology: v6e:2x2x1
jax: 0.10.0
libtpu: 0.0.40
codegen_flags: <defaults>
</compile_context>

<pallas_src>
import functools
import math

import jax
import jax.numpy as jnp
from jax.experimental import pallas as pl
from jax.experimental.pallas import tpu as pltpu


# ----------------------------------------------------------------------------
# In-kernel helpers
# ----------------------------------------------------------------------------
_GELU_C = math.sqrt(2.0 / math.pi)


def _gelu(x):
    # TODO(synk): PyTorch nn.GELU default is the exact erf form; tanh approximation used
    # here (tanh goes to the EUP slot, the polynomial is cheap VALU filler).
    return 0.5 * x * (1.0 + jnp.tanh(_GELU_C * (x + 0.044715 * x * x * x)))


def _ffn_channel_first(x, w1_t_ref, b1_ref, w2_t_ref, b2_ref, out_dtype):
    """mmcv FFN (eval), channel-first: x (D, TL) -> x + W2^T GELU(W1^T x + b1) + b2.

    x is consumed in its native dtype (no f32 round-trip before the MXU); matmuls
    accumulate in f32, biases are f32, the residual add happens once in f32 and the
    result is cast exactly once at the store.
    """
    wdt = w1_t_ref.dtype
    xw = x if x.dtype == wdt else x.astype(wdt)
    h = jnp.dot(w1_t_ref[...], xw, preferred_element_type=jnp.float32) + b1_ref[...]
    h = _gelu(h).astype(wdt)
    y = jnp.dot(w2_t_ref[...], h, preferred_element_type=jnp.float32) + b2_ref[...]
    res = x if x.dtype == jnp.float32 else x.astype(jnp.float32)
    return (res + y).astype(out_dtype)


# ----------------------------------------------------------------------------
# Phase 1: CSE attention logits (reduction over L-tiles) + softmax
# ----------------------------------------------------------------------------
def _cse_attn_kernel(feat_ref, st_ref, attn_ref, acc_ref, *, scale):
    l = pl.program_id(1)

    @pl.when(l == 0)
    def _():
        acc_ref[...] = jnp.zeros_like(acc_ref)

    f = feat_ref[0]                       # (C, TL), native dtype
    s = st_ref[0]                         # (N, TL), native dtype
    # attn^T accumulation: f @ s^T -> (C, N).  Only the tiny token operand gets
    # transposed by Mosaic, never the large feat tile.
    acc_ref[...] += jax.lax.dot_general(
        f, s, (((1,), (1,)), ((), ())), preferred_element_type=jnp.float32)

    @pl.when(l == pl.num_programs(1) - 1)
    def _():
        # TODO(synk): 1/sqrt(L) scale unverified against the reference CSE implementation.
        logits = acc_ref[...].T * scale                        # (N, C): tiny one-off transpose
        logits = logits - jnp.max(logits, axis=-1, keepdims=True)
        e = jnp.exp(logits)
        # approx reciprocal -> EUP slot (otherwise idle); rows sum to 1 only to ~1e-3.
        attn = e * pl.reciprocal(jnp.sum(e, axis=-1, keepdims=True), approx=True)
        attn_ref[0] = attn.astype(attn_ref.dtype)


# ----------------------------------------------------------------------------
# Phase 2: apply attention + FFNs, fully parallel over (B, L-tiles)
# ----------------------------------------------------------------------------
def _apply_kernel(attn_ref, feat_ref,
                  st_w1_ref, st_b1_ref, st_w2_ref, st_b2_ref,
                  ft_w1_ref, ft_b1_ref, ft_w2_ref, ft_b2_ref,
                  feat_out_ref, st_out_ref):
    f = feat_ref[0]                                                    # (C, TL)
    attn = attn_ref[0]                                                 # (N, C)
    st_new = jnp.dot(attn, f, preferred_element_type=jnp.float32)      # (N, TL) f32
    st_out_ref[0] = _ffn_channel_first(st_new, st_w1_ref, st_b1_ref,
                                       st_w2_ref, st_b2_ref, st_out_ref.dtype)
    # feat FFN runs directly on f's native dtype (no f32 round-trip).
    feat_out_ref[0] = _ffn_channel_first(f, ft_w1_ref, ft_b1_ref,
                                         ft_w2_ref, ft_b2_ref, feat_out_ref.dtype)


def _apply_final_kernel(attn_ref, feat_ref,
                        st_w1_ref, st_b1_ref, st_w2_ref, st_b2_ref,
                        st_out_ref):
    f = feat_ref[0]
    attn = attn_ref[0]
    st_new = jnp.dot(attn, f, preferred_element_type=jnp.float32)
    st_out_ref[0] = _ffn_channel_first(st_new, st_w1_ref, st_b1_ref,
                                       st_w2_ref, st_b2_ref, st_out_ref.dtype)


# ----------------------------------------------------------------------------
# Tiling / VMEM sizing helpers
# ----------------------------------------------------------------------------
def _vmem_limit_bytes():
    try:
        cap = pltpu.get_tpu_info().vmem_capacity_bytes
    except Exception:
        cap = 64 * 1024 * 1024        # conservative fallback (v7x-sized)
    return int(cap * 0.75)            # ~96 MiB on v5e/v6e, ~48 MiB on v7x


def _pick_l_tile(L, per_lane_bytes, budget):
    """Largest L-tile (multiple of 128 dividing L) whose working set fits the budget."""
    if L % 128 != 0:
        return L                      # full-extent block (allowed even if not 128-aligned)
    best = 128
    for t in range(128, L + 1, 128):
        if L % t == 0 and t * per_lane_bytes <= budget:
            best = t
    return best


# ----------------------------------------------------------------------------
# StructBlock wrapper
# ----------------------------------------------------------------------------
class StructBlockPallas:
    def __init__(self, feat_channels, num_tokens, ffn_feat_hidden, ffn_st_hidden,
                 final_block=False, key=None, param_dtype=jnp.bfloat16):
        self.final_block = final_block
        self.feat_channels = feat_channels
        self.num_tokens = num_tokens
        self.ffn_feat_hidden = ffn_feat_hidden
        self.ffn_st_hidden = ffn_st_hidden
        self.param_dtype = param_dtype
        key = jax.random.PRNGKey(0) if key is None else key
        ks = jax.random.split(key, 4)

        def linear_t(k, din, dout):
            # weights pre-transposed for channel-first application; biases kept f32
            # (added straight into the f32 matmul accumulator).
            kw, kb = jax.random.split(k)
            w = (jax.random.normal(kw, (din, dout), jnp.float32) * 0.02).astype(param_dtype)
            b = (jax.random.normal(kb, (dout,), jnp.float32) * 0.02).astype(jnp.float32)
            return w.T, b.reshape(dout, 1)

        # FFN over the struct-token channel dim (N)
        self.st_w1_t, self.st_b1 = linear_t(ks[0], num_tokens, ffn_st_hidden)
        self.st_w2_t, self.st_b2 = linear_t(ks[1], ffn_st_hidden, num_tokens)
        self._params = [self.st_w1_t, self.st_b1, self.st_w2_t, self.st_b2]
        if not final_block:
            # FFN over the feature-map channel dim (C)
            self.ft_w1_t, self.ft_b1 = linear_t(ks[2], feat_channels, ffn_feat_hidden)
            self.ft_w2_t, self.ft_b2 = linear_t(ks[3], ffn_feat_hidden, feat_channels)
            self._params += [self.ft_w1_t, self.ft_b1, self.ft_w2_t, self.ft_b2]

    def __call__(self, feat, struct_tokens):
        B, C, H, W = feat.shape
        N = struct_tokens.shape[1]
        L = H * W
        feat_flat = feat.reshape(B, C, L)          # free reshape, no transpose
        st_flat = struct_tokens.reshape(B, N, L)

        f_st = self.ffn_st_hidden
        f_ft = 0 if self.final_block else self.ffn_feat_hidden
        isz = feat.dtype.itemsize
        osz = struct_tokens.dtype.itemsize

        vmem_limit = _vmem_limit_bytes()
        weight_bytes = sum(int(p.size) * p.dtype.itemsize for p in self._params)
        # Rough VMEM bytes per spatial element in the apply phase: double-buffered feat
        # in/out + st out (counted at 4 B to be safe) + f32 intermediates.
        per_lane = 4 * (2 * C + (0 if self.final_block else 2 * C) + 2 * N
                        + 2 * (N + C + f_st + f_ft))
        budget = max(vmem_limit - weight_bytes - (4 << 20), 4 << 20)
        tl = _pick_l_tile(L, per_lane, budget)
        nl = L // tl

        def tile_spec(rows):
            return pl.BlockSpec((1, rows, tl), lambda b, l: (b, 0, l))

        def const_spec(arr):
            # constant across the whole grid -> single-buffer (no point double-buffering)
            shape = arr.shape
            return pl.BlockSpec(shape, lambda b, l, _n=len(shape): (0,) * _n,
                                pipeline_mode=pl.Buffered(1))

        attn_spec = pl.BlockSpec((1, N, C), lambda b, l: (b, 0, 0))

        # ---------------- Phase 1: attention logits + softmax ----------------
        scale = 1.0 / math.sqrt(L)
        attn = pl.pallas_call(
            functools.partial(_cse_attn_kernel, scale=scale),
            out_shape=jax.ShapeDtypeStruct((B, N, C), feat.dtype),
            grid_spec=pltpu.PrefetchScalarGridSpec(
                num_scalar_prefetch=0,
                grid=(B, nl),
                in_specs=[tile_spec(C), tile_spec(N)],
                out_specs=attn_spec,
                scratch_shapes=[pltpu.VMEM((C, N), jnp.float32)]),
            compiler_params=pltpu.CompilerParams(
                dimension_semantics=("parallel", "arbitrary"),
                vmem_limit_bytes=vmem_limit),
            cost_estimate=pl.CostEstimate(
                flops=2 * B * C * N * L,
                transcendentals=B * N * C,
                bytes_accessed=B * (C + N) * L * isz + B * N * C * isz),
        )(feat_flat, st_flat)

        st_specs = [const_spec(self.st_w1_t), const_spec(self.st_b1),
                    const_spec(self.st_w2_t), const_spec(self.st_b2)]
        cparams2 = pltpu.CompilerParams(
            dimension_semantics=("parallel", "parallel"),
            vmem_limit_bytes=vmem_limit)

        # ---------------- Phase 2: apply attention + FFNs --------------------
        if self.final_block:
            st_out = pl.pallas_call(
                _apply_final_kernel,
                out_shape=jax.ShapeDtypeStruct((B, N, L), struct_tokens.dtype),
                grid_spec=pltpu.PrefetchScalarGridSpec(
                    num_scalar_prefetch=0,
                    grid=(B, nl),
                    in_specs=[attn_spec, tile_spec(C)] + st_specs,
                    out_specs=tile_spec(N)),
                compiler_params=cparams2,
                cost_estimate=pl.CostEstimate(
                    flops=2 * B * N * C * L + 4 * B * N * f_st * L,
                    transcendentals=B * f_st * L,
                    bytes_accessed=(B * C * L * isz + B * N * C * isz
                                    + weight_bytes + B * N * L * osz)),
            )(attn, feat_flat,
              self.st_w1_t, self.st_b1, self.st_w2_t, self.st_b2)
            return st_out.reshape(B, N, H, W)

        ft_specs = [const_spec(self.ft_w1_t), const_spec(self.ft_b1),
                    const_spec(self.ft_w2_t), const_spec(self.ft_b2)]

        feat_out, st_out = pl.pallas_call(
            _apply_kernel,
            out_shape=(jax.ShapeDtypeStruct((B, C, L), feat.dtype),
                       jax.ShapeDtypeStruct((B, N, L), struct_tokens.dtype)),
            grid_spec=pltpu.PrefetchScalarGridSpec(
                num_scalar_prefetch=0,
                grid=(B, nl),
                in_specs=[attn_spec, tile_spec(C)] + st_specs + ft_specs,
                out_specs=[tile_spec(C), tile_spec(N)]),
            compiler_params=cparams2,
            cost_estimate=pl.CostEstimate(
                flops=(2 * B * N * C * L + 4 * B * N * f_st * L
                       + 4 * B * C * f_ft * L),
                transcendentals=B * (f_st + f_ft) * L,
                bytes_accessed=(B * C * L * isz + B * N * C * isz + weight_bytes
                                + B * (C + N) * L * osz)),
        )(attn, feat_flat,
          self.st_w1_t, self.st_b1, self.st_w2_t, self.st_b2,
          self.ft_w1_t, self.ft_b1, self.ft_w2_t, self.ft_b2)

        return feat_out.reshape(B, C, H, W), st_out.reshape(B, N, H, W)


if __name__ == "__main__":
    B, C, N, H, W = 2, 32, 8, 16, 16
    key = jax.random.PRNGKey(0)
    k_feat, k_st, k_params = jax.random.split(key, 3)

    # bf16 HBM-facing tensors: the kernel is HBM-bound, f32 kept only in MXU
    # accumulation and the softmax.
    feat = jax.random.normal(k_feat, (B, C, H, W), jnp.float32).astype(jnp.bfloat16)
    struct_tokens = jax.random.normal(k_st, (B, N, H, W), jnp.float32).astype(jnp.bfloat16)

    # non-final block: returns (feat, struct_tokens)
    block = StructBlockPallas(
        feat_channels=C, num_tokens=N,
        ffn_feat_hidden=64, ffn_st_hidden=32,
        final_block=False, key=k_params)
    feat_out, st_out = block(feat, struct_tokens)
    jax.block_until_ready((feat_out, st_out))
    assert feat_out.shape == (B, C, H, W) and feat_out.dtype == feat.dtype
    assert st_out.shape == (B, N, H, W) and st_out.dtype == struct_tokens.dtype

    # final block: returns struct_tokens only
    block_final = StructBlockPallas(
        feat_channels=C, num_tokens=N,
        ffn_feat_hidden=64, ffn_st_hidden=32,
        final_block=True, key=k_params)
    st_only = block_final(feat, struct_tokens)
    jax.block_until_ready(st_only)
    assert st_only.shape == (B, N, H, W)

    print("KERNEL_OK")
</pallas_src>

<mosaic_0001>
module attributes {stable_mosaic.version = 11 : i64} {
  func.func @_cse_attn_kernel(%arg0: i32, %arg1: i32, %arg2: memref<1x32x256xbf16, #tpu.memory_space<vmem>>, %arg3: memref<1x8x256xbf16, #tpu.memory_space<vmem>>, %arg4: memref<1x8x32xbf16, #tpu.memory_space<vmem>>, %arg5: memref<32x8xf32, #tpu.memory_space<vmem>>) attributes {dimension_semantics = [#tpu.dimension_semantics<parallel>, #tpu.dimension_semantics<arbitrary>], iteration_bounds = array<i64: 2, 1>, scalar_prefetch = 0 : i64, scratch_operands = 1 : i64, tpu.core_type = #tpu.core_type<tc>, window_params = [{transform_indices = @transform_0, window_bounds = array<i64: 1, 32, 256>}, {transform_indices = @transform_1, window_bounds = array<i64: 1, 8, 256>}, {transform_indices = @transform_2, window_bounds = array<i64: 1, 8, 32>}]} {
    %c0_i32 = arith.constant 0 : i32
    %0 = arith.cmpi eq, %arg1, %c0_i32 : i32
    %1 = arith.extui %0 : i1 to i32
    %c0_i32_0 = arith.constant 0 : i32
    %2 = arith.cmpi ne, %1, %c0_i32_0 : i32
    scf.if %2 {
      %cst_12 = arith.constant 0.000000e+00 : f32
      %14 = vector.broadcast %cst_12 : f32 to vector<32x8xf32>
      %c0_13 = arith.constant 0 : index
      %c0_14 = arith.constant 0 : index
      %15 = vector.load %arg5[%c0_13, %c0_14] : memref<32x8xf32, #tpu.memory_space<vmem>>, vector<32x8xf32>
      tpu.vector_store %arg5[%c0_13, %c0_14], %14 {strides = array<i32>} : memref<32x8xf32, #tpu.memory_space<vmem>>, vector<32x8xf32>,
    } else {
    }
    %c0 = arith.constant 0 : index
    %c0_1 = arith.constant 0 : index
    %c0_2 = arith.constant 0 : index
    %3 = vector.load %arg2[%c0, %c0_1, %c0_2] : memref<1x32x256xbf16, #tpu.memory_space<vmem>>, vector<1x32x256xbf16>
    %4 = vector.shape_cast %3 : vector<1x32x256xbf16> to vector<32x256xbf16>
    %c0_3 = arith.constant 0 : index
    %c0_4 = arith.constant 0 : index
    %c0_5 = arith.constant 0 : index
    %5 = vector.load %arg3[%c0_3, %c0_4, %c0_5] : memref<1x8x256xbf16, #tpu.memory_space<vmem>>, vector<1x8x256xbf16>
    %6 = vector.shape_cast %5 : vector<1x8x256xbf16> to vector<8x256xbf16>
    %c0_6 = arith.constant 0 : index
    %c0_7 = arith.constant 0 : index
    %7 = vector.load %arg5[%c0_6, %c0_7] : memref<32x8xf32, #tpu.memory_space<vmem>>, vector<32x8xf32>
    %cst = arith.constant dense<0.000000e+00> : vector<32x8xf32>
    %8 = tpu.matmul %4, %6, %cst {dimension_numbers = #tpu.dot_dimension_numbers<[1], [1], [0], [0], [0, 0, 1, 0], [], []>} : vector<32x256xbf16>, vector<8x256xbf16>, vector<32x8xf32> -> vector<32x8xf32>
    %9 = arith.addf %7, %8 : vector<32x8xf32>
    %c0_8 = arith.constant 0 : index
    %c0_9 = arith.constant 0 : index
    %10 = vector.load %arg5[%c0_8, %c0_9] : memref<32x8xf32, #tpu.memory_space<vmem>>, vector<32x8xf32>
    tpu.vector_store %arg5[%c0_8, %c0_9], %9 {strides = array<i32>} : memref<32x8xf32, #tpu.memory_space<vmem>>, vector<32x8xf32>,
    %c0_i32_10 = arith.constant 0 : i32
    %11 = arith.cmpi eq, %arg1, %c0_i32_10 : i32
    %12 = arith.extui %11 : i1 to i32
    %c0_i32_11 = arith.constant 0 : i32
    %13 = arith.cmpi ne, %12, %c0_i32_11 : i32
    scf.if %13 {
      %c0_12 = arith.constant 0 : index
      %c0_13 = arith.constant 0 : index
      %14 = vector.load %arg5[%c0_12, %c0_13] : memref<32x8xf32, #tpu.memory_space<vmem>>, vector<32x8xf32>
      %15 = tpu.transpose %14, [1, 0] : vector<32x8xf32> -> vector<8x32xf32>
      %cst_14 = arith.constant 6.250000e-02 : f32
      %16 = vector.broadcast %cst_14 : f32 to vector<8x32xf32>
      %17 = arith.mulf %15, %16 : vector<8x32xf32>
      %cst_15 = arith.constant dense<0xFF800000> : vector<8xf32>
      %18 = vector.multi_reduction <maximumf>, %17, %cst_15 [1] : vector<8x32xf32> to vector<8xf32>
      %19 = vector.shape_cast %18 : vector<8xf32> to vector<8x1xf32>
      %20 = vector.broadcast %19 : vector<8x1xf32> to vector<8x32xf32>
      %21 = arith.subf %17, %20 : vector<8x32xf32>
      %22 = math.exp %21 : vector<8x32xf32>
      %cst_16 = arith.constant dense<0.000000e+00> : vector<8xf32>
      %23 = vector.multi_reduction <add>, %22, %cst_16 [1] : vector<8x32xf32> to vector<8xf32>
      %24 = vector.shape_cast %23 : vector<8xf32> to vector<8x1xf32>
      %25 = tpu.reciprocal %24 {approx = true} : vector<8x1xf32> -> vector<8x1xf32>
      %26 = vector.broadcast %25 : vector<8x1xf32> to vector<8x32xf32>
      %27 = arith.mulf %22, %26 : vector<8x32xf32>
      %28 = arith.truncf %27 : vector<8x32xf32> to vector<8x32xbf16>
      %c0_17 = arith.constant 0 : index
      %c0_18 = arith.constant 0 : index
      %c0_19 = arith.constant 0 : index
      %29 = vector.load %arg4[%c0_17, %c0_18, %c0_19] : memref<1x8x32xbf16, #tpu.memory_space<vmem>>, vector<1x8x32xbf16>
      %30 = vector.shape_cast %29 : vector<1x8x32xbf16> to vector<8x32xbf16>
      %31 = vector.shape_cast %28 : vector<8x32xbf16> to vector<1x8x32xbf16>
      tpu.vector_store %arg4[%c0_17, %c0_18, %c0_19], %31 {strides = array<i32>} : memref<1x8x32xbf16, #tpu.memory_space<vmem>>, vector<1x8x32xbf16>,
    } else {
    }
    return
  }
  func.func @transform_0(%arg0: i32, %arg1: i32) -> (i32, i32, i32) {
    %c0_i32 = arith.constant 0 : i32
    %c0_i32_0 = arith.constant 0 : i32
    return %arg0, %c0_i32, %arg1 : i32, i32, i32
  }
  func.func @transform_1(%arg0: i32, %arg1: i32) -> (i32, i32, i32) {
    %c0_i32 = arith.constant 0 : i32
    %c0_i32_0 = arith.constant 0 : i32
    return %arg0, %c0_i32, %arg1 : i32, i32, i32
  }
  func.func @transform_2(%arg0: i32, %arg1: i32) -> (i32, i32, i32) {
    %c0_i32 = arith.constant 0 : i32
    %c0_i32_0 = arith.constant 0 : i32
    %c0_i32_1 = arith.constant 0 : i32
    return %arg0, %c0_i32, %c0_i32_0 : i32, i32, i32
  }
}

</mosaic_0001>

<bundles_post_ra>
// kernel: tpu_custom_call.1
= control target key start
LH: loop header
LB: loop body
LE: loop exit
PB: predicated region body
PF: predicated region fallthrough
CT: control target
= control target key end

     0   :  { %7 = vsyncpa [#allocation4], 0  ;;  %s946_s0 = inlined_call_operand.hbm [shape: bf16[2,32,256], index: 0, kind: input, shape index: {}]   ;;  %s947_s1 = inlined_call_operand.hbm [shape: bf16[2,8,256], index: 1, kind: input, shape index: {}]   ;;  %s948_s2 = inlined_call_operand.hbm [shape: bf16[2,8,32], index: 2, kind: output, shape index: {}]  }
   0x1   :  { %9 = vsyncpa [#allocation4 + $0x1], 0 }
   0x2   :  { %10 = vsyncpa [#allocation7], 0 }
   0x3   :  { %12 = vsyncpa [#allocation7 + $0x1], 0 }
   0x4   :  { %13 = vsyncpa [#allocation5], 0 }
   0x5   :  { %15 = vsyncpa [#allocation5 + $0x1], 0  ;;  %s775_s9 = smov 0   ;;  %s777_s10 = smov 0  }
   0x6   :  { %s779_s11 = smov 0   ;;  %s781_s12 = smov 0  }
   0x7   :  { %s783_s13 = smov 0   ;;  %s785_s14 = smov 0  }
   0x8 LB: > { %s502_s15 = sadd.s32 4294967295, %s752_s14   ;;  %s503_s16 = sadd.s32 4294967294, %s752_s14   ;;  %s752_s14 = sphi %s785_s14, %s21_s14   ;;  %s748_s13 = sphi %s783_s13, %s960_s13   ;;  %s744_s12 = sphi %s781_s12, %s959_s12   ;;  %s740_s11 = sphi %s779_s11, %s958_s11   ;;  %s736_s10 = sphi %s777_s10, %s957_s10   ;;  %s732_s9 = sphi %s775_s9, %s956_s9  }
   0x9   : > { %s33_s17 = sadd.s32 1, %s748_s13  ;;  %s42_s18 = sadd.s32 1, %s740_s11 }
   0xa   : > { %p35_p0 = scmp.ge.s32.totalorder %s33_s17, 2  ;;  %p49_p1 = scmp.ne.s32.totalorder %s740_s11, %s736_s10 }
   0xb   : > { %p50_p2 = scmp.eq.s32.totalorder %s752_s14, 0  ;;  %p55_p3 = scmp.ne.s32.totalorder %s736_s10, %s732_s9 }
   0xc   : > { %s962_s17 = smov (%p35_p0, %s33_s17), 0  ;;  %p56_p5 = scmp.eq.s32.totalorder %s502_s15, 0 }
   0xd   : > { %p816_p4 = por %p50_p2, %p49_p1  ;;  %s37_s20 = ssub.s32 %s748_s13, %s962_s17 }
   0xe   : > { %p107_p6 = scmp.eq.s32.totalorder %s502_s15, 1  ;;  %p40_p7 = scmp.eq.s32.totalorder %s37_s20, 0 }
   0xf   : > { %p822_p8 = por %p56_p5, %p55_p3  ;;  %p113_p10 = scmp.eq.s32.totalorder %s503_s16, 1 }
  0x10   : > { %p826_p9 = por %p107_p6, %p49_p1  ;;  %p547_p13 = scmp.lt.s32.totalorder %s752_s14, 2 }
  0x11   : > { %s831_s23 = scalar_select %p40_p7, %s740_s11, %s42_s18  }
  0x12   : > { %p833_p11 = por %p113_p10, %p55_p3  ;;  %s840_s25 = sand.u32 1, %s740_s11  }
  0x13   : > { %s506_s26 = sshll.u32 %s840_s25, 5  ;;  %s526_s27 = sshll.u32 %s748_s13, 9 }
  0x14   : > { %s145_s30 = scalar_lea.hbm %s946_s0, %s526_s27  ;;  %s137_s3 = scalar_lea.vmem [#allocation3], %s506_s26 }
  0x15   : > { %s146_s4 = sshll.u32 %s137_s3, 4  ;;  %p849_p0 = pnand %p547_p13, %p816_p4  ;;  %s147_s4 = int_to_ptr.vmem [resolvable:$true] %s146_s4 }
  0x16   : > { %p512_p1 = scmp.ge.s32.totalorder %s752_s14, 1  ;;  %s134_s6 = scalar_lea.sflag [#allocation4], %s840_s25 }
  0x17   : > { %p614_p2 = pneg %p849_p0  ;;  %s625_s7 = scalar_lea.vmem %s147_s4, 512 }
  0x18   : > { %p626_p3 = scmp.ne.s32.totalorder %s147_s4, %s625_s7  ;;  %s754_s8 = smov [#allocation3]  }
  0x19   : > { %s630_s15 = sshll.u32 %s754_s8, 4  ;;  %s631_s15 = int_to_ptr.vmem [resolvable:$false] %s630_s15 }
  0x1a   : > { %p628_p5 = pnand %p626_p3, %p614_p2  ;;  %s632_s16 = scalar_lea.vmem %s631_s15, 1024 }
  0x1b   : > { %p633_p4 = scmp.lt.s32.totalorder %s147_s4, %s631_s15  ;;  %p634_p7 = scmp.lt.s32.totalorder %s632_s16, %s625_s7 }
  0x1c   : > { %p629_p6 = pneg %p628_p5 }
  0x1d   : > { %p635_p10 = por %p634_p7, %p633_p4 }
  0x1f   : > { %p636_p13 = pnand %p635_p10, %p629_p6 }
  0x21   : > { %639 = shalt.err (!%p636_p13)
}
  0x22   : > { %s755_s18 = smov 128   ;;  %s756_s19 = smov 8  }
  0x23   : > { %539 = dma.hbm_to_vmem [thread:$0]  (!%p849_p0), %s145_s30, 512, %s147_s4, %s134_s6, %s755_s18, %s755_s18, %s756_s19  }
  0x24   : > { %p175_p3 = scmp.lt.s32.totalorder %s752_s14, 3  ;;  %s509_s20 = sshll.u32 %s840_s25, 3 }
  0x25   : > { %s527_s26 = sshll.u32 %s748_s13, 7  ;;  %s160_s7 = scalar_lea.vmem [#allocation6], %s509_s20 }
  0x26   : > { %p867_p5 = pnand %p512_p1, %p175_p3  ;;  %s168_s3 = scalar_lea.hbm %s947_s1, %s527_s26 }
  0x27   : > { %s170_s8 = sshll.u32 %s160_s7, 4  ;;  %s157_s15 = scalar_lea.sflag [#allocation7], %s840_s25  ;;  %s171_s8 = int_to_ptr.vmem [resolvable:$true] %s170_s8 }
  0x28   : > { %s653_s16 = scalar_lea.vmem %s171_s8, 128  ;;  %s757_s30 = smov [#allocation6]  }
  0x29   : > { %p654_p6 = scmp.ne.s32.totalorder %s171_s8, %s653_s16  ;;  %s658_s4 = sshll.u32 %s757_s30, 4  ;;  %s659_s4 = int_to_ptr.vmem [resolvable:$false] %s658_s4 }
  0x2a   : > { %s660_s6 = scalar_lea.vmem %s659_s4, 256  ;;  %p661_p1 = scmp.lt.s32.totalorder %s171_s8, %s659_s4 }
  0x2b   : > { %p656_p4 = pnand %p654_p6, %p614_p2  ;;  %p662_p10 = scmp.lt.s32.totalorder %s660_s6, %s653_s16 }
  0x2d   : > { %p657_p7 = pneg %p656_p4  ;;  %p663_p13 = por %p662_p10, %p661_p1 }
  0x2f   : > { %p664_p3 = pnand %p663_p13, %p657_p7 }
  0x31   : > { %667 = shalt.err (!%p664_p3)
}
  0x32   : > { %542 = dma.hbm_to_vmem [thread:$0]  (!%p849_p0), %s168_s3, 128, %s171_s8, %s157_s15  }
  0x33   : > { %179 = sbr.rel (%p867_p5) target bundleno = 728 (0x2d8), region = 28  ;;  %s883_s25 = sand.u32 (!%p867_p5), 1, %s736_s10  }
  0x34   : > { %s513_s18 = sshll.u32 (!%p867_p5), %s883_s25, 5  ;;  %s182_s19 = scalar_lea.sflag (!%p867_p5), [#allocation4], %s883_s25 }
  0x35   : > { %s185_s20 = scalar_lea.vmem (!%p867_p5), [#allocation3], %s513_s18 }
  0x38   : > { %719 = dma.done.wait (%p822_p8), %s182_s19, 512  }
  0x39   : > { %721 = vsyncadd (%p822_p8), %s182_s19, 4294966784  ;;  %s514_s5 = sshll.u32 %s883_s25, 3  ;;  %s191_s26 = scalar_lea.sflag [#allocation7], %s883_s25 }
  0x3a   : > { %s194_s27 = scalar_lea.vmem [#allocation6], %s514_s5 }
  0x3b   : > { %723 = dma.done.wait (%p822_p8), %s191_s26, 128  }
  0x3c   : > { %725 = vsyncadd (%p822_p8), %s191_s26, 4294967168  ;;  %vm227_vm0 = vcmask 64512   ;;  %v758_v0 = vmov 0.0   ;;  %v236_v1 = vld [vmem:[%s194_s27] sm:$0xff]  ;;  %v607_v5 = vld [vmem:[%s185_s20 + $0x14] ss:$8 sps:$4 sm:$0xff]  }
  0x3d   : > { %228 = vst.msk [vmem:[#allocation2] sm:$0xff] %vm227_vm0, %v758_v0  ;;  %229 = vst.msk [vmem:[#allocation2 + $0x8] sm:$0xff] %vm227_vm0, %v758_v0  ;;  %v521_v2 = vcombine.high %v236_v1, %v236_v1  ;;  %v520_v3 = vcombine.low %v236_v1, %v236_v1  ;;  %v604_v4 = vld [vmem:[%s185_s20 + $0x4] ss:$8 sps:$4 sm:$0xff]   ;;  %308 = vmatprep.mubr.bf16.mxu1 %v607_v5  ;;  %v602_v6 = vld [vmem:[%s185_s20] ss:$8 sps:$4 sm:$0xff]  }
  0x3e   : > { %230 = vst.msk [vmem:[#allocation2 + $0x10] sm:$0xff] %vm227_vm0, %v758_v0  ;;  %231 = vst.msk [vmem:[#allocation2 + $0x18] sm:$0xff] %vm227_vm0, %v758_v0  ;;  %300 = vmatprep.mubr.bf16.mxu0 %v604_v4  ;;  %v605_v7 = vld [vmem:[%s185_s20 + $0x10] ss:$8 sps:$4 sm:$0xff]   ;;  %vm366_vm1 = vcmask 261120   ;;  %s515_s21 = sshll.u32 %s883_s25, 2 }
  0x3f   : > { %282 = vmatprep.subr.bf16.mxu0 %v521_v2  ;;  %528 = vmatprep.subr.bf16.mxu1 %v521_v2  ;;  %s523_s28 = sshll.u32 %s744_s12, 6  ;;  %s219_s29 = scalar_lea.vmem [#allocation8], %s515_s21  ;;  %vm379_vm2 = vcmask 257024  }
  0x40   : > { %283 = vmatpush1.bf16.xpose.msra.mxu0 %v520_v3  ;;  %529 = vmatpush1.bf16.xpose.msra.mxu1 %v520_v3  ;;  %s395_s3 = sshll.u32 %s219_s29, 4  ;;  %s393_s15 = scalar_lea.hbm %s948_s2, %s523_s28  ;;  %s396_s3 = int_to_ptr.vmem [resolvable:$true] %s395_s3 }
  0x41   : > { %s382_s16 = scalar_lea.sflag [#allocation5], %s883_s25  ;;  %s668_s30 = scalar_lea.vmem %s396_s3, 64 }
  0x42   : > { %p669_p8 = scmp.ne.s32.totalorder %s396_s3, %s668_s30  ;;  %s759_s4 = smov [#allocation8]  }
  0x43   : > { %s672_s6 = sshll.u32 %s759_s4, 4  ;;  %s673_s6 = int_to_ptr.vmem [resolvable:$false] %s672_s6 }
  0x44   : > { %v237_v8 = vld [vmem:[#allocation2] sm:$0xff]  ;;  %v238_v15 = vld [vmem:[#allocation2 + $0x8] sm:$0xff]  ;;  %p670_p0 = pnand %p669_p8, %p826_p9  ;;  %s674_s12 = scalar_lea.vmem %s673_s6, 128 }
  0x45   : > { %v239_v9 = vld [vmem:[#allocation2 + $0x10] sm:$0xff]  ;;  %v240_v17 = vld [vmem:[#allocation2 + $0x18] sm:$0xff]  ;;  %p675_p5 = scmp.lt.s32.totalorder %s396_s3, %s673_s6  ;;  %p676_p6 = scmp.lt.s32.totalorder %s674_s12, %s668_s30 }
  0x46   : > { %p671_p2 = pneg %p670_p0 }
  0x47   : > { %301 = vmatmul.mubr.bf16.vlgmr.msra.gmra.mxu0 %v602_v6  ;;  %309 = vmatmul.mubr.bf16.vlgmr.msra.gmra.mxu1 %v605_v7  ;;  %p677_p4 = por %p676_p6, %p675_p5 }
  0x49   : > { %p678_p7 = pnand %p677_p4, %p671_p2 }
 0x107   : > { %v302_v10 = vpop.f32.mrf.mxu0  ;;  %v310_v11 = vpop.f32.mrf.mxu1 }
 0x108   : > { %v317_v12 = vadd.f32 %v302_v10, %v237_v8  ;;  %v319_v13 = vadd.f32 %v310_v11, %v239_v9 }
 0x109   : > { %v304_v14 = vpop.f32.mrf.mxu0  ;;  %v312_v16 = vpop.f32.mrf.mxu1 }
 0x10a   : > { %322 = vst.msk [vmem:[#allocation2] sm:$0xff] %vm227_vm0, %v317_v12  ;;  %324 = vst.msk [vmem:[#allocation2 + $0x10] sm:$0xff] %vm227_vm0, %v319_v13 }
 0x10b   : > { %v305_v18 = vpop.f32.mrf.mxu0  ;;  %v313_v19 = vpop.f32.mrf.mxu1 }
 0x10c   : > { %v318_v20 = vadd.f32 %v305_v18, %v238_v15  ;;  %v320_v21 = vadd.f32 %v313_v19, %v240_v17 }
 0x10d   : > { %v307_v22 = vpop.f32.mrf.mxu0  ;;  %v315_v23 = vpop.f32.mrf.mxu1 }
 0x10e   : > { %323 = vst.msk [vmem:[#allocation2 + $0x8] sm:$0xff] %vm227_vm0, %v318_v20  ;;  %325 = vst.msk [vmem:[#allocation2 + $0x18] sm:$0xff] %vm227_vm0, %v320_v21 }
 0x111   : > { %v329_v24 = vld [vmem:[#allocation2] sm:$0xff]  ;;  %v331_v26 = vld [vmem:[#allocation2 + $0x10] sm:$0xff] }
 0x112   : > { %333 = vxpose.xlu0.b32.start [1/4] (short) (narrow) %v329_v24, 8 }
 0x115   : > { %v330_v25 = vld [vmem:[#allocation2 + $0x8] sm:$0xff]  ;;  %v332_v27 = vld [vmem:[#allocation2 + $0x18] sm:$0xff] }
 0x116   : > { %334 = vxpose.xlu0.b32.cont [2/4] (short) (narrow) %v330_v25, 8 }
 0x11a   : > { %335 = vxpose.xlu0.b32.cont [3/4] (short) (narrow) %v331_v26, 8 }
 0x11e   : > { %336 = vxpose.xlu0.b32.end [4/4] (short) (narrow) %v332_v27, 8 }
 0x18e   : > { %v349_v28 = vpop.trf.xlu0 }
 0x18f   : > { %v365_v29 = vmul.f32 0.0625, %v349_v28 }
 0x191   : > { %v367_v30 = vsel %vm366_vm1, %v365_v29, -inf }
 0x192   : > { %368 = vmax.xlane.f32.xlu1 %v367_v30 }
 0x21b   : > { %v369_v31 = vpop.xlane.xlu1 %368 }
 0x21c   : > { %v370_v32 = vsub.f32 %v365_v29, %v369_v31 }
 0x21e   : > { %v371_v33 = vmul.f32 1.442695, %v370_v32 }
 0x220   : > { %608 = vpow2.f32 %v371_v33 }
 0x22d   : > { %v609_v34 = vpop.eup %608 }
 0x22e   : > { %v373_v35 = vsel %vm366_vm1, %v609_v34, 0.0 }
 0x22f   : > { %374 = vadd.xlane.f32.xlu1 %v373_v35 }
 0x2b8   : > { %v375_v36 = vpop.xlane.xlu1 %374 }
 0x2b9   : > { %610 = vrcp.f32 %v375_v36 }
 0x2c6   : > { %v611_v37 = vpop.eup %610 }
 0x2c7   : > { %v377_v38 = vmul.f32 %v611_v37, %v609_v34 }
 0x2c9   : > { %v378_v39 = vpack.c.bf16 %v377_v38, %v377_v38 }
 0x2cb   : > { %380 = vst.msk [vmem:[%s219_s29] sm:$0xf] %vm379_vm2, %v378_v39 }
 0x2cc   : > { %681 = shalt.err (!%p678_p7)
}
 0x2cd   : > { %s682_s18 = scalar_lea.hbm %s393_s15, 64  ;;  %s686_s20 = scalar_lea.hbm %s948_s2, 128 }
 0x2ce   : > { %p683_p1 = scmp.ne.s32.totalorder %s393_s15, %s682_s18  ;;  %p687_p3 = scmp.lt.s32.totalorder %s393_s15, %s948_s2 }
 0x2cf   : > { %p688_p8 = scmp.lt.s32.totalorder %s686_s20, %s682_s18 }
 0x2d0   : > { %p684_p10 = pnand %p683_p1, %p826_p9 }
 0x2d1   : > { %p689_p0 = por %p688_p8, %p687_p3 }
 0x2d2   : > { %p685_p13 = pneg %p684_p10 }
 0x2d4   : > { %p690_p12 = pnand %p689_p0, %p685_p13 }
 0x2d6   : > { %693 = shalt.err (!%p690_p12)
}
 0x2d7   : > { %534 = dma.vmem_to_hbm [thread:$0]  (%p826_p9), %s396_s3, 64, %s393_s15, %s382_s16  }
 0x2d8 PF: > { %s407_s27 = sand.u32 1, %s732_s9   ;;  %p955_p2 = scmp.ge.s32.totalorder %s752_s14, 2 }
 0x2d9   : > { %s408_s21 = scalar_lea.sflag [#allocation5], %s407_s27 }
 0x2da   : > { %p544_p5 = pnand %p955_p2, %p833_p11 }
 0x2dc   : > { %p545_p6 = pneg %p544_p5 }
 0x2de   : > { %727 = dma.done.wait (%p545_p6), %s408_s21, 64  }
 0x2df   : > { %729 = vsyncadd (%p545_p6), %s408_s21, 4294967232  ;;  %s21_s14 = sadd.s32 1, %s752_s14   ;;  %s956_s9 = smov %s736_s10 }
 0x2e0   : > { %p18_p4 = scmp.ge.s32.totalorder %s21_s14, 4   ;;  %s957_s10 = smov %s740_s11 }
 0x2e1   : > { %s958_s11 = smov %s831_s23  ;;  %s959_s12 = smov %s748_s13 }
 0x2e2   : > { %s960_s13 = smov %s962_s17  ;;  %20 = sbr.rel (!%p18_p4) target bundleno = 8 (0x8), region = 94 }
 0x2e7   :  { %413 = vsyncpa [#allocation4], 1 }
 0x2e8   :  { %415 = vsyncpa [#allocation4 + $0x1], 1 }
 0x2e9   :  { %416 = vsyncpa [#allocation7], 1 }
 0x2ea   :  { %418 = vsyncpa [#allocation7 + $0x1], 1 }
 0x2eb   :  { %419 = vsyncpa [#allocation5], 1 }
 0x2ec   :  { %421 = vsyncpa [#allocation5 + $0x1], 1 }

</bundles_post_ra>
